<compile_context>
chip_gen: v5e
topology: v5e:2x2
jax: 0.10.0
libtpu: 0.0.40
codegen_flags: <defaults>
</compile_context>

<pallas_src>
import functools

import jax
import jax.numpy as jnp
from jax import lax
from jax.experimental import pallas as pl
from jax.experimental.pallas import tpu as pltpu


def _reference(V, mask, R1, R2):
    # pure-JAX reference mirroring the PyTorch forward (eval mode, no dropout)
    w = jnp.einsum("hsk,hkt->hst", R1, R2)                  # (H, S, S)
    w = jnp.broadcast_to(w[None], (V.shape[0],) + w.shape)
    w = w - 1e6 * (1.0 - mask[:, None, None, :])
    attn = jax.nn.softmax(w, axis=-1)
    return jnp.einsum("bhst,bhtd->bhsd", attn, V)


def _attn_kernel(r1_ref, r2_ref, mask_ref, v_ref, o_ref, *, approx_recip):
    # r1_ref  : (TQ, K)     compute dtype   R1[h, q-tile]
    # r2_ref  : (K, S)      compute dtype   R2[h]
    # mask_ref: (B, S)      f32             raw 0/1 mask
    # v_ref   : (B, S, D)   compute dtype   V[:, h]
    # o_ref   : (B, TQ, D)                  out[:, h, q-tile]
    batch = v_ref.shape[0]

    # Factor scores + exp(. - rowmax) depend only on (head, q-tile):
    # computed once per grid step, reused for every batch below.
    w = jnp.dot(r1_ref[...], r2_ref[...],
                preferred_element_type=jnp.float32)                      # (TQ, S) f32
    e_all = jnp.exp(w - jnp.max(w, axis=-1, keepdims=True))              # (TQ, S) f32

    def body(b, carry):
        # Zeroing masked key columns + renormalizing == softmax with a -1e6 additive bias.
        m = mask_ref[pl.ds(b, 1), :]                                     # (1, S) f32
        e = e_all * m                                                    # (TQ, S)
        denom = jnp.sum(e, axis=-1, keepdims=True)                       # (TQ, 1)
        inv = pl.reciprocal(jnp.maximum(denom, 1e-30), approx=approx_recip)
        attn = (e * inv).astype(v_ref.dtype)                             # (TQ, S)
        out = jnp.dot(attn, v_ref[b], preferred_element_type=jnp.float32)  # (TQ, D)
        o_ref[b] = out.astype(o_ref.dtype)
        return carry

    # Unrolled so the LLO scheduler can overlap VPU/XLU/EUP/MXU/store across batches.
    lax.fori_loop(0, batch, body, 0, unroll=True)


def _pick_tq(S, *, budget_bytes=8 * 1024 * 1024):
    """Largest query tile keeping ~4 live (tq, S) f32 tiles within budget (v7x-safe)."""
    max_tq = max(8, budget_bytes // (4 * 4 * S))
    if S <= max_tq:
        return S
    for cand in (512, 256, 128, 64, 32, 16, 8):
        if cand <= max_tq and S % cand == 0:
            return cand
    return S  # ragged S (e.g. ViT 197): single query tile


def factorized_random_self_attention(V, mask, R1, R2, *,
                                     compute_dtype=jnp.bfloat16, tq=None,
                                     small_problem_fallback=False):
    """V: (B,H,S,D), mask: (B,S), R1: (H,S,K), R2: (H,K,S) -> (B,H,S,D)."""
    B, H, S, D = V.shape
    K = R1.shape[-1]

    # Optional tiny-problem escape hatch: below vreg-tile scale a fused XLA einsum wins.
    if small_problem_fallback and (S < 128 and D < 128):
        return _reference(V.astype(jnp.float32), mask.astype(jnp.float32),
                          R1.astype(jnp.float32), R2.astype(jnp.float32)).astype(V.dtype)

    if tq is None:
        tq = _pick_tq(S)
    assert S % tq == 0
    qt = S // tq

    r1 = R1.astype(compute_dtype)
    r2 = R2.astype(compute_dtype)
    v = V.astype(compute_dtype)
    m = mask.astype(jnp.float32)

    approx = compute_dtype != jnp.float32
    kernel = functools.partial(_attn_kernel, approx_recip=approx)

    in_item = jnp.dtype(compute_dtype).itemsize
    out_item = jnp.dtype(V.dtype).itemsize
    cost = pl.CostEstimate(
        flops=int(2 * H * S * K * S + 2 * B * H * S * S * D),
        transcendentals=int(H * S * S),          # exp computed once per head, not per batch
        bytes_accessed=int((r1.size + r2.size + v.size) * in_item
                           + m.size * 4 + B * H * S * D * out_item),
    )

    return pl.pallas_call(
        kernel,
        out_shape=jax.ShapeDtypeStruct((B, H, S, D), V.dtype),
        grid_spec=pltpu.PrefetchScalarGridSpec(
            num_scalar_prefetch=0,
            grid=(H, qt),
            in_specs=[
                pl.BlockSpec((None, tq, K), lambda h, q: (h, q, 0)),       # R1[h, q-tile]
                pl.BlockSpec((None, K, S), lambda h, q: (h, 0, 0)),        # R2[h] (resident over q)
                pl.BlockSpec((B, S), lambda h, q: (0, 0)),                 # mask (resident)
                pl.BlockSpec((B, None, S, D), lambda h, q: (0, h, 0, 0)),  # V[:, h] (resident over q)
            ],
            out_specs=pl.BlockSpec((B, None, tq, D), lambda h, q: (0, h, q, 0)),
        ),
        compiler_params=pltpu.CompilerParams(
            dimension_semantics=("parallel", "parallel"),
            vmem_limit_bytes=32 * 1024 * 1024,   # lift v5e's 16 MiB scoped default; safe on v6e/v7x
        ),
        cost_estimate=cost,
    )(r1, r2, m, v)


if __name__ == "__main__":
    # Config-implied small shapes: num_head=4, seq_len=8, factor_k=4, head_dim=8, batch=2.
    B, H, S, D, Kf = 2, 4, 8, 8, 4

    key = jax.random.PRNGKey(0)
    k_r1, k_r2, k_v, k_m, k_r1b, k_r2b, k_vb, k_mb = jax.random.split(key, 8)

    # deterministic parameter init (torch.nn.init.normal_(std=0.02))
    R1 = 0.02 * jax.random.normal(k_r1, (H, S, Kf), dtype=jnp.float32)
    R2 = 0.02 * jax.random.normal(k_r2, (H, Kf, S), dtype=jnp.float32)

    V = jax.random.normal(k_v, (B, H, S, D), dtype=jnp.float32)
    mask = (jax.random.uniform(k_m, (B, S)) > 0.2).astype(jnp.float32)
    mask = mask.at[:, 0].set(1.0)   # at least one valid position per row

    ref = _reference(V, mask, R1, R2)

    # exact path (f32 operands, exact reciprocal) -- tight tolerance
    out_f32 = jax.block_until_ready(
        factorized_random_self_attention(V, mask, R1, R2, compute_dtype=jnp.float32))
    assert out_f32.shape == (B, H, S, D)
    assert jnp.allclose(out_f32, ref, atol=1e-5, rtol=1e-5)

    # fast path (bf16 MXU operands, f32 accumulate, approx EUP reciprocal)
    out_bf16 = jax.block_until_ready(
        factorized_random_self_attention(V, mask, R1, R2, compute_dtype=jnp.bfloat16))
    assert out_bf16.shape == (B, H, S, D)
    assert jnp.allclose(out_bf16, ref, atol=3e-2, rtol=3e-2)

    # Second, multi-tile config exercising the (H, qt) grid + in-kernel unrolled batch loop.
    B2, H2, S2, D2, K2 = 2, 2, 256, 64, 8
    R1b = 0.02 * jax.random.normal(k_r1b, (H2, S2, K2), dtype=jnp.float32)
    R2b = 0.02 * jax.random.normal(k_r2b, (H2, K2, S2), dtype=jnp.float32)
    Vb = jax.random.normal(k_vb, (B2, H2, S2, D2), dtype=jnp.float32)
    maskb = (jax.random.uniform(k_mb, (B2, S2)) > 0.2).astype(jnp.float32)
    maskb = maskb.at[:, 0].set(1.0)

    refb = _reference(Vb, maskb, R1b, R2b)
    outb = jax.block_until_ready(
        factorized_random_self_attention(Vb, maskb, R1b, R2b,
                                         compute_dtype=jnp.float32, tq=128))
    assert outb.shape == (B2, H2, S2, D2)
    assert jnp.allclose(outb, refb, atol=2e-3, rtol=2e-3)

    print("KERNEL_OK")
</pallas_src>

<mosaic_0001>
module attributes {stable_mosaic.version = 11 : i64} {
  func.func @_attn_kernel(%arg0: i32, %arg1: i32, %arg2: memref<1x8x4xf32, #tpu.memory_space<vmem>>, %arg3: memref<1x4x8xf32, #tpu.memory_space<vmem>>, %arg4: memref<2x8xf32, #tpu.memory_space<vmem>>, %arg5: memref<2x1x8x8xf32, #tpu.memory_space<vmem>>, %arg6: memref<2x1x8x8xf32, #tpu.memory_space<vmem>>) attributes {dimension_semantics = [#tpu.dimension_semantics<parallel>, #tpu.dimension_semantics<parallel>], iteration_bounds = array<i64: 4, 1>, scalar_prefetch = 0 : i64, scratch_operands = 0 : i64, tpu.core_type = #tpu.core_type<tc>, window_params = [{transform_indices = @transform_0, window_bounds = array<i64: 1, 8, 4>}, {transform_indices = @transform_1, window_bounds = array<i64: 1, 4, 8>}, {pipeline_mode = #tpu.pipeline_mode<synchronous>, transform_indices = @transform_2, window_bounds = array<i64: 2, 8>}, {transform_indices = @transform_3, window_bounds = array<i64: 2, 1, 8, 8>}, {transform_indices = @transform_4, window_bounds = array<i64: 2, 1, 8, 8>}]} {
    %c0 = arith.constant 0 : index
    %c0_0 = arith.constant 0 : index
    %c0_1 = arith.constant 0 : index
    %0 = vector.load %arg2[%c0, %c0_0, %c0_1] : memref<1x8x4xf32, #tpu.memory_space<vmem>>, vector<1x8x4xf32>
    %1 = vector.shape_cast %0 : vector<1x8x4xf32> to vector<8x4xf32>
    %c0_2 = arith.constant 0 : index
    %c0_3 = arith.constant 0 : index
    %c0_4 = arith.constant 0 : index
    %2 = vector.load %arg3[%c0_2, %c0_3, %c0_4] : memref<1x4x8xf32, #tpu.memory_space<vmem>>, vector<1x4x8xf32>
    %3 = vector.shape_cast %2 : vector<1x4x8xf32> to vector<4x8xf32>
    %cst = arith.constant dense<0.000000e+00> : vector<8x8xf32>
    %4 = tpu.matmul %1, %3, %cst {dimension_numbers = #tpu.dot_dimension_numbers<[1], [0], [0], [1], [0, 0, 1, 1], [], []>} : vector<8x4xf32>, vector<4x8xf32>, vector<8x8xf32> -> vector<8x8xf32>
    %cst_5 = arith.constant dense<0xFF800000> : vector<8xf32>
    %5 = vector.multi_reduction <maximumf>, %4, %cst_5 [1] : vector<8x8xf32> to vector<8xf32>
    %6 = vector.shape_cast %5 : vector<8xf32> to vector<8x1xf32>
    %7 = vector.broadcast %6 : vector<8x1xf32> to vector<8x8xf32>
    %8 = arith.subf %4, %7 : vector<8x8xf32>
    %9 = math.exp %8 : vector<8x8xf32>
    %c0_i32 = arith.constant 0 : i32
    %10 = arith.index_cast %c0_i32 : i32 to index
    %c0_6 = arith.constant 0 : index
    %11 = vector.load %arg4[%10, %c0_6] : memref<2x8xf32, #tpu.memory_space<vmem>>, vector<1x8xf32>
    %12 = vector.broadcast %11 : vector<1x8xf32> to vector<8x8xf32>
    %13 = arith.mulf %9, %12 : vector<8x8xf32>
    %cst_7 = arith.constant dense<0.000000e+00> : vector<8xf32>
    %14 = vector.multi_reduction <add>, %13, %cst_7 [1] : vector<8x8xf32> to vector<8xf32>
    %15 = vector.shape_cast %14 : vector<8xf32> to vector<8x1xf32>
    %cst_8 = arith.constant 1.000000e-30 : f32
    %16 = vector.broadcast %cst_8 : f32 to vector<8x1xf32>
    %17 = arith.maximumf %15, %16 : vector<8x1xf32>
    %18 = tpu.reciprocal %17 : vector<8x1xf32> -> vector<8x1xf32>
    %19 = vector.broadcast %18 : vector<8x1xf32> to vector<8x8xf32>
    %20 = arith.mulf %13, %19 : vector<8x8xf32>
    %21 = arith.index_cast %c0_i32 : i32 to index
    %c0_9 = arith.constant 0 : index
    %c0_10 = arith.constant 0 : index
    %c0_11 = arith.constant 0 : index
    %22 = vector.load %arg5[%21, %c0_9, %c0_10, %c0_11] : memref<2x1x8x8xf32, #tpu.memory_space<vmem>>, vector<1x1x8x8xf32>
    %23 = vector.shape_cast %22 : vector<1x1x8x8xf32> to vector<8x8xf32>
    %cst_12 = arith.constant dense<0.000000e+00> : vector<8x8xf32>
    %24 = tpu.matmul %20, %23, %cst_12 {dimension_numbers = #tpu.dot_dimension_numbers<[1], [0], [0], [1], [0, 0, 1, 1], [], []>} : vector<8x8xf32>, vector<8x8xf32>, vector<8x8xf32> -> vector<8x8xf32>
    %25 = arith.index_cast %c0_i32 : i32 to index
    %c0_13 = arith.constant 0 : index
    %c0_14 = arith.constant 0 : index
    %c0_15 = arith.constant 0 : index
    %26 = vector.load %arg6[%25, %c0_13, %c0_14, %c0_15] : memref<2x1x8x8xf32, #tpu.memory_space<vmem>>, vector<1x1x8x8xf32>
    %27 = vector.shape_cast %26 : vector<1x1x8x8xf32> to vector<8x8xf32>
    %28 = vector.shape_cast %24 : vector<8x8xf32> to vector<1x1x8x8xf32>
    tpu.vector_store %arg6[%25, %c0_13, %c0_14, %c0_15], %28 {strides = array<i32>} : memref<2x1x8x8xf32, #tpu.memory_space<vmem>>, vector<1x1x8x8xf32>,
    %c1_i32 = arith.constant 1 : i32
    %29 = arith.index_cast %c1_i32 : i32 to index
    %c0_16 = arith.constant 0 : index
    %30 = vector.load %arg4[%29, %c0_16] : memref<2x8xf32, #tpu.memory_space<vmem>>, vector<1x8xf32>
    %31 = vector.broadcast %30 : vector<1x8xf32> to vector<8x8xf32>
    %32 = arith.mulf %9, %31 : vector<8x8xf32>
    %cst_17 = arith.constant dense<0.000000e+00> : vector<8xf32>
    %33 = vector.multi_reduction <add>, %32, %cst_17 [1] : vector<8x8xf32> to vector<8xf32>
    %34 = vector.shape_cast %33 : vector<8xf32> to vector<8x1xf32>
    %cst_18 = arith.constant 1.000000e-30 : f32
    %35 = vector.broadcast %cst_18 : f32 to vector<8x1xf32>
    %36 = arith.maximumf %34, %35 : vector<8x1xf32>
    %37 = tpu.reciprocal %36 : vector<8x1xf32> -> vector<8x1xf32>
    %38 = vector.broadcast %37 : vector<8x1xf32> to vector<8x8xf32>
    %39 = arith.mulf %32, %38 : vector<8x8xf32>
    %40 = arith.index_cast %c1_i32 : i32 to index
    %c0_19 = arith.constant 0 : index
    %c0_20 = arith.constant 0 : index
    %c0_21 = arith.constant 0 : index
    %41 = vector.load %arg5[%40, %c0_19, %c0_20, %c0_21] : memref<2x1x8x8xf32, #tpu.memory_space<vmem>>, vector<1x1x8x8xf32>
    %42 = vector.shape_cast %41 : vector<1x1x8x8xf32> to vector<8x8xf32>
    %cst_22 = arith.constant dense<0.000000e+00> : vector<8x8xf32>
    %43 = tpu.matmul %39, %42, %cst_22 {dimension_numbers = #tpu.dot_dimension_numbers<[1], [0], [0], [1], [0, 0, 1, 1], [], []>} : vector<8x8xf32>, vector<8x8xf32>, vector<8x8xf32> -> vector<8x8xf32>
    %44 = arith.index_cast %c1_i32 : i32 to index
    %c0_23 = arith.constant 0 : index
    %c0_24 = arith.constant 0 : index
    %c0_25 = arith.constant 0 : index
    %45 = vector.load %arg6[%44, %c0_23, %c0_24, %c0_25] : memref<2x1x8x8xf32, #tpu.memory_space<vmem>>, vector<1x1x8x8xf32>
    %46 = vector.shape_cast %45 : vector<1x1x8x8xf32> to vector<8x8xf32>
    %47 = vector.shape_cast %43 : vector<8x8xf32> to vector<1x1x8x8xf32>
    tpu.vector_store %arg6[%44, %c0_23, %c0_24, %c0_25], %47 {strides = array<i32>} : memref<2x1x8x8xf32, #tpu.memory_space<vmem>>, vector<1x1x8x8xf32>,
    %c2_i32 = arith.constant 2 : i32
    return
  }
  func.func @transform_0(%arg0: i32, %arg1: i32) -> (i32, i32, i32) {
    %c0_i32 = arith.constant 0 : i32
    %c0_i32_0 = arith.constant 0 : i32
    return %arg0, %arg1, %c0_i32 : i32, i32, i32
  }
  func.func @transform_1(%arg0: i32, %arg1: i32) -> (i32, i32, i32) {
    %c0_i32 = arith.constant 0 : i32
    %c0_i32_0 = arith.constant 0 : i32
    %c0_i32_1 = arith.constant 0 : i32
    return %arg0, %c0_i32, %c0_i32_0 : i32, i32, i32
  }
  func.func @transform_2(%arg0: i32, %arg1: i32) -> (i32, i32) {
    %c0_i32 = arith.constant 0 : i32
    %c0_i32_0 = arith.constant 0 : i32
    %c0_i32_1 = arith.constant 0 : i32
    return %c0_i32, %c0_i32_0 : i32, i32
  }
  func.func @transform_3(%arg0: i32, %arg1: i32) -> (i32, i32, i32, i32) {
    %c0_i32 = arith.constant 0 : i32
    %c0_i32_0 = arith.constant 0 : i32
    %c0_i32_1 = arith.constant 0 : i32
    %c0_i32_2 = arith.constant 0 : i32
    return %c0_i32, %arg0, %c0_i32_0, %c0_i32_1 : i32, i32, i32, i32
  }
  func.func @transform_4(%arg0: i32, %arg1: i32) -> (i32, i32, i32, i32) {
    %c0_i32 = arith.constant 0 : i32
    %c0_i32_0 = arith.constant 0 : i32
    %c0_i32_1 = arith.constant 0 : i32
    return %c0_i32, %arg0, %arg1, %c0_i32_0 : i32, i32, i32, i32
  }
}

</mosaic_0001>

<bundles_post_ra>
// kernel: tpu_custom_call.1
= control target key start
LH: loop header
LB: loop body
LE: loop exit
PB: predicated region body
PF: predicated region fallthrough
CT: control target
= control target key end

     0   :  { %9 = vsyncpa [#allocation3], 0  ;;  %s923_s0 = inlined_call_operand.vmem [shape: f32[4,8,4], index: 0, kind: input, shape index: {}]   ;;  %s924_s1 = inlined_call_operand.vmem [shape: f32[4,4,8], index: 1, kind: input, shape index: {}]   ;;  %s925_s2 = inlined_call_operand.vmem [shape: f32[2,8], index: 2, kind: input, shape index: {}]   ;;  %s926_s3 = inlined_call_operand.hbm [shape: f32[2,4,8,8], index: 3, kind: input, shape index: {}]   ;;  %s927_s4 = inlined_call_operand.hbm [shape: f32[2,4,8,8], index: 4, kind: output, shape index: {}]  }
   0x1   :  { %11 = vsyncpa [#allocation3 + $0x1], 0 }
   0x2   :  { %12 = vsyncpa [#allocation4], 0 }
   0x3   :  { %14 = vsyncpa [#allocation4 + $0x1], 0  ;;  %s776_s15 = smov 0   ;;  %s778_s16 = smov 0  }
   0x4   :  { %s780_s17 = smov 0   ;;  %s782_s18 = smov 0  }
   0x5   :  { %s784_s19 = smov 0   ;;  %s786_s20 = smov 0  }
   0x6 LB: > { %s534_s21 = sadd.s32 4294967295, %s743_s20   ;;  %s535_s22 = sadd.s32 4294967294, %s743_s20   ;;  %s743_s20 = sphi %s786_s20, %s20_s20   ;;  %s739_s19 = sphi %s784_s19, %s936_s19   ;;  %s735_s18 = sphi %s782_s18, %s935_s18   ;;  %s731_s17 = sphi %s780_s17, %s934_s17   ;;  %s727_s16 = sphi %s778_s16, %s933_s16   ;;  %s723_s15 = sphi %s776_s15, %s932_s15  }
   0x7   : > { %s32_s23 = sadd.s32 1, %s739_s19  ;;  %s114_s24 = sadd.s32 1, %s731_s17 }
   0x8   : > { %p34_p0 = scmp.ge.s32.totalorder %s32_s23, 4  ;;  %p121_p1 = scmp.ne.s32.totalorder %s731_s17, %s727_s16 }
   0x9   : > { %p122_p2 = scmp.eq.s32.totalorder %s743_s20, 0  ;;  %p127_p3 = scmp.ne.s32.totalorder %s727_s16, %s723_s15 }
   0xa   : > { %s938_s23 = smov (%p34_p0, %s32_s23), 0  ;;  %p128_p5 = scmp.eq.s32.totalorder %s534_s21, 0 }
   0xb   : > { %p817_p4 = por %p122_p2, %p121_p1  ;;  %s111_s26 = ssub.s32 %s739_s19, %s938_s23 }
   0xc   : > { %p153_p6 = scmp.eq.s32.totalorder %s534_s21, 3  ;;  %p112_p7 = scmp.eq.s32.totalorder %s111_s26, 0 }
   0xd   : > { %p823_p8 = por %p128_p5, %p127_p3  ;;  %p159_p10 = scmp.eq.s32.totalorder %s535_s22, 3 }
   0xe   : > { %p827_p9 = por %p153_p6, %p121_p1  ;;  %p567_p12 = scmp.lt.s32.totalorder %s743_s20, 4 }
   0xf   : > { %s832_s29 = scalar_select %p112_p7, %s731_s17, %s114_s24  }
  0x10   : > { %p834_p11 = por %p159_p10, %p127_p3  ;;  %s199_s5 = sand.u32 1, %s731_s17  }
  0x11   : > { %s538_s6 = sshll.u32 %s199_s5, 4  ;;  %s539_s7 = sshll.u32 %s739_s19, 3 }
  0x12   : > { %s207_s10 = scalar_lea.hbm %s926_s3, %s539_s7  ;;  %s203_s11 = scalar_lea.vmem [#allocation2], %s538_s6 }
  0x13   : > { %s210_s12 = sshll.u32 %s203_s11, 4  ;;  %s208_s13 = sshll.u32 %s207_s10, 4  ;;  %s211_s12 = int_to_ptr.vmem [resolvable:$true] %s210_s12  ;;  %s209_s13 = int_to_ptr.hbm [resolvable:$true] %s208_s13 }
  0x14   : > { %p560_p13 = pnand %p567_p12, %p817_p4  ;;  %s200_s14 = scalar_lea.sflag [#allocation3], %s199_s5 }
  0x15   : > { %s745_s21 = smov 512   ;;  %s746_s22 = smov 128  }
  0x16   : > { %s747_s24 = smov 8   ;;  %p540_p0 = scmp.ge.s32.totalorder %s743_s20, 1 }
  0x17   : > { %562 = dma.hbm_to_vmem [thread:$0]  (!%p560_p13), %s209_s13, 256, %s211_s12, %s200_s14, %s745_s21, %s746_s22, %s747_s24  }
  0x18   : > { %p218_p1 = scmp.lt.s32.totalorder %s743_s20, 5 }
  0x1a   : > { %p219_p2 = pnand %p540_p0, %p218_p1 }
  0x1b   : > { %s849_s26 = sand.u32 (!%p219_p2), 1, %s727_s16  }
  0x1c   : > { %222 = sbr.rel (%p219_p2) target bundleno = 573 (0x23d), region = 36  ;;  %s541_s6 = sshll.u32 (!%p219_p2), %s849_s26, 4 }
  0x1d   : > { %s225_s7 = scalar_lea.sflag (!%p219_p2), [#allocation3], %s849_s26  ;;  %s855_s25 = scalar_lea.vmem (!%p219_p2), [#allocation2], %s541_s6 }
  0x21   : > { %714 = dma.done.wait (%p823_p8), %s225_s7, 256  }
  0x22   : > { %716 = vsyncadd (%p823_p8), %s225_s7, 4294967040  ;;  %p265_p3 = scmp.lt.s32.totalorder %s735_s18, 3  ;;  %vm282_vm0 = vcmask 1043456   ;;  %vm278_vm1 = vcmask 31744   ;;  %vm306_vm2 = vcmask 64512   ;;  %v335_v14 = vld [vmem:[%s855_s25] sm:$0xff] }
  0x23   : > { %v623_v7 = vld [vmem:[%s925_s2 + $0x1] ss:$0 sm:$0xff]  ;;  %v624_v8 = vld [vmem:[%s925_s2] ss:$0 sm:$0xff]  ;;  %v548_v15 = vld [vmem:[%s855_s25 + $0x8] sm:$0xff]  ;;  %354 = vmatpush.msra.mxu1 %v335_v14  ;;  %s552_s25 = sshll.u32 %s735_s18, 3 }
  0x24   : > { %s266_s5 = scalar_select %p265_p3, %s735_s18, 3  ;;  %402 = vmatpush.msra.mxu2 %v548_v15 }
  0x25   : > { %s264_s10 = scalar_lea.vmem [#allocation5], %s541_s6  ;;  %s410_s13 = scalar_lea.sflag [#allocation4], %s849_s26 }
  0x26   : > { %s544_s8 = sshll.u32 %s266_s5, 2  ;;  %s543_s9 = sshll.u32 %s266_s5, 3 }
  0x27   : > { %s275_s12 = scalar_lea.vmem %s924_s1, %s544_s8  ;;  %s271_s21 = scalar_lea.vmem %s923_s0, %s543_s9 }
  0x28   : > { %v277_v0 = vld [vmem:[%s275_s12] sm:$0xf]  ;;  %s421_s9 = scalar_lea.hbm %s927_s4, %s552_s25  ;;  %s422_s11 = sshll.u32 %s264_s10, 4  ;;  %s423_s11 = int_to_ptr.vmem [resolvable:$true] %s422_s11 }
  0x29   : > { %v276_v1 = vld [vmem:[%s271_s21] sm:$0xff]  ;;  %545 = vmatpush.msk.msra.mxu0 %vm282_vm0, %v277_v0  ;;  %s424_s12 = sshll.u32 %s421_s9, 4  ;;  %s681_s27 = scalar_lea.hbm %s927_s4, 64  ;;  %s425_s12 = int_to_ptr.hbm [resolvable:$true] %s424_s12 }
  0x2a   : > { %546 = vmatmul.msk.f32.vlgmr.msra.gmra.mxu0 %vm278_vm1, %v276_v1  ;;  %s675_s14 = sshra.s32 %s425_s12, 4  ;;  %s676_s14 = int_to_ptr.hbm [resolvable:$true] %s675_s14 }
  0x2b   : > { %s677_s18 = scalar_lea.hbm %s676_s14, 16  ;;  %p682_p7 = scmp.lt.s32.totalorder %s676_s14, %s927_s4 }
  0x2c   : > { %p678_p4 = scmp.ne.s32.totalorder %s676_s14, %s677_s18  ;;  %p683_p8 = scmp.lt.s32.totalorder %s681_s27, %s677_s18 }
  0x2e   : > { %p679_p5 = pnand %p678_p4, %p827_p9  ;;  %p684_p10 = por %p683_p8, %p682_p7 }
  0x30   : > { %p680_p6 = pneg %p679_p5 }
  0x32   : > { %p685_p12 = pnand %p684_p10, %p680_p6 }
  0xa7   : > { %v303_v2 = vpop.f32.mrf.mxu0 }
  0xa8   : > { %v307_v3 = vsel %vm306_vm2, %v303_v2, -inf }
  0xa9   : > { %308 = vmax.xlane.f32.xlu0 %v307_v3 }
 0x11c   : > { %v309_v4 = vpop.xlane.xlu0 %308 }
 0x11d   : > { %v310_v5 = vsub.f32 %v303_v2, %v309_v4 }
 0x11f   : > { %v311_v6 = vmul.f32 1.442695, %v310_v5 }
 0x121   : > { %625 = vpow2.f32 %v311_v6 }
 0x127   : > { %v626_v9 = vpop.eup %625 }
 0x128   : > { %v362_v10 = vmul.f32 %v626_v9, %v623_v7  ;;  %v315_v11 = vmul.f32 %v626_v9, %v624_v8 }
 0x12a   : > { %v363_v12 = vsel %vm306_vm2, %v362_v10, 0.0  ;;  %v316_v13 = vsel %vm306_vm2, %v315_v11, 0.0 }
 0x12b   : > { %364 = vadd.xlane.f32.xlu0 %v363_v12  ;;  %317 = vadd.xlane.f32.xlu1 %v316_v13 }
 0x19e   : > { %v365_v16 = vpop.xlane.xlu0 %364  ;;  %v318_v17 = vpop.xlane.xlu1 %317 }
 0x19f   : > { %v366_v18 = vmax.f32 %v365_v16, 1e-30  ;;  %v319_v19 = vmax.f32 %v318_v17, 1e-30 }
 0x1a1   : > { %627 = vrcp.f32 %v366_v18  ;;  %v378_v26 = vand.u32 2147483648, %v366_v18  ;;  %v331_v27 = vand.u32 2147483648, %v319_v19  ;;  %v376_v29 = vand.u32 2147483647, %v366_v18 }
 0x1a2   : > { %629 = vrcp.f32 %v319_v19  ;;  %v329_v31 = vand.u32 2147483647, %v319_v19  ;;  %vm372_vm5 = vweird.f32 %v366_v18  ;;  %vm325_vm6 = vweird.f32 %v319_v19 }
 0x1a3   : > { %v379_v34 = vor.u32 1.1754944e-38, %v378_v26  ;;  %v332_v35 = vor.u32 1.1754944e-38, %v331_v27  ;;  %vm377_vm9 = vcmp.eq.f32.partialorder %v376_v29, 8.507059e+37 }
 0x1a4   : > { %vm330_vm10 = vcmp.eq.f32.partialorder %v329_v31, 8.507059e+37 }
 0x1a7   : > { %v628_v20 = vpop.eup %627 }
 0x1a8   : > { %v630_v21 = vpop.eup %629  ;;  %v368_v22 = vmul.f32 %v628_v20, %v366_v18  ;;  %vm373_vm3 = vweird.f32 %v628_v20 }
 0x1a9   : > { %v321_v23 = vmul.f32 %v630_v21, %v319_v19  ;;  %vm326_vm4 = vweird.f32 %v630_v21  ;;  %vm374_vm7 = vmor %vm372_vm5, %vm373_vm3 }
 0x1aa   : > { %v369_v24 = vsub.f32 1.0, %v368_v22  ;;  %vm327_vm8 = vmor %vm325_vm6, %vm326_vm4 }
 0x1ab   : > { %v322_v25 = vsub.f32 1.0, %v321_v23 }
 0x1ac   : > { %v370_v28 = vmul.f32 %v628_v20, %v369_v24 }
 0x1ad   : > { %v323_v30 = vmul.f32 %v630_v21, %v322_v25 }
 0x1ae   : > { %v371_v32 = vadd.f32 %v628_v20, %v370_v28 }
 0x1af   : > { %v324_v33 = vadd.f32 %v630_v21, %v323_v30 }
 0x1b0   : > { %v375_v36 = vsel %vm374_vm7, %v628_v20, %v371_v32 }
 0x1b1   : > { %v328_v37 = vsel %vm327_vm8, %v630_v21, %v324_v33  ;;  %v380_v38 = vsel %vm377_vm9, %v379_v34, %v375_v36 }
 0x1b2   : > { %v333_v39 = vsel %vm330_vm10, %v332_v35, %v328_v37  ;;  %v381_v40 = vmul.f32 %v380_v38, %v362_v10 }
 0x1b3   : > { %v334_v41 = vmul.f32 %v333_v39, %v315_v11 }
 0x1b4   : > { %549 = vmatmul.msk.f32.vlgmr.msra.gmra.mxu2 %vm306_vm2, %v381_v40 }
 0x1b5   : > { %547 = vmatmul.msk.f32.vlgmr.msra.gmra.mxu1 %vm306_vm2, %v334_v41 }
 0x232   : > { %v356_v42 = vpop.f32.mrf.mxu1 }
 0x233   : > { %359 = vst.msk [vmem:[%s264_s10] sm:$0xff] %vm306_vm2, %v356_v42 }
 0x237   : > { %v404_v43 = vpop.f32.mrf.mxu2 }
 0x238   : > { %550 = vst.msk [vmem:[%s264_s10 + $0x8] sm:$0xff] %vm306_vm2, %v404_v43 }
 0x239   : > { %688 = shalt.err (!%p685_p12)
}
 0x23a   : > { %s748_s26 = smov 128   ;;  %s749_s7 = smov 512  }
 0x23b   : > { %s750_s25 = smov 8  }
 0x23c   : > { %557 = dma.vmem_to_hbm [thread:$0]  (%p827_p9), %s423_s11, 256, %s425_s12, %s410_s13, %s748_s26, %s749_s7, %s750_s25  }
 0x23d PF: > { %p568_p13 = scmp.ge.s32.totalorder %s743_s20, 2  ;;  %s439_s5 = sand.u32 1, %s723_s15  }
 0x23e   : > { %s440_s8 = scalar_lea.sflag [#allocation4], %s439_s5 }
 0x23f   : > { %p564_p0 = pnand %p568_p13, %p834_p11 }
 0x241   : > { %p565_p1 = pneg %p564_p0 }
 0x243   : > { %718 = dma.done.wait (%p565_p1), %s440_s8, 256  }
 0x244   : > { %720 = vsyncadd (%p565_p1), %s440_s8, 4294967040  ;;  %s20_s20 = sadd.s32 1, %s743_s20   ;;  %s932_s15 = smov %s727_s16 }
 0x245   : > { %p17_p2 = scmp.ge.s32.totalorder %s20_s20, 6   ;;  %s933_s16 = smov %s731_s17 }
 0x246   : > { %s934_s17 = smov %s832_s29  ;;  %s935_s18 = smov %s739_s19 }
 0x247   : > { %s936_s19 = smov %s938_s23  ;;  %19 = sbr.rel (!%p17_p2) target bundleno = 6 (0x6), region = 89 }
 0x24c   :  { %446 = vsyncpa [#allocation3], 1 }
 0x24d   :  { %448 = vsyncpa [#allocation3 + $0x1], 1 }
 0x24e   :  { %449 = vsyncpa [#allocation4], 1 }
 0x24f   :  { %451 = vsyncpa [#allocation4 + $0x1], 1 }

</bundles_post_ra>
